<compile_context>
chip_gen: v7x
topology: tpu7x:2x2x1
jax: 0.10.0
libtpu: 0.0.40
codegen_flags: <defaults>
</compile_context>

<pallas_src>
import math

import jax
import jax.numpy as jnp
from jax.experimental import pallas as pl
from jax.experimental.pallas import tpu as pltpu


# ---------------------------------------------------------------------------
# Static model dims (match the torch module defaults used in __main__).
# ---------------------------------------------------------------------------
VOCAB = 50
EMB = 32
HID = 32
TMP = 32
OUT = 4
SEQ = 8

V_PAD = ((VOCAB + 7) // 8) * 8          # 56: token-table rows, sublane aligned
WIDTH = max(HID, TMP)                   # slab lane width (32 here; H == T)

# Row offsets of each sub-block inside the packed weight slab (all 8-aligned).
TABLE_OFF = 0                           # (V_PAD, H): emb @ W_ih^T + b_ih + b_hh
WHH_OFF = TABLE_OFF + V_PAD             # (H, H)    : W_hh^T
WA_OFF = WHH_OFF + HID                  # (H, T)    : Double_Linear.weightA
WB_OFF = WA_OFF + HID                   # (H, T)    : Double_Linear.weightB
WLIN_OFF = WB_OFF + HID                 # (T, WIDTH): final Linear weight^T (O cols used)
BBI_OFF = WLIN_OFF + TMP                # 1 row     : Double_Linear.bias
BLIN_OFF = BBI_OFF + 8                  # 1 row     : final Linear bias (O cols used)
SLAB_ROWS = BLIN_OFF + 8                # 200


def att_simple_rnn_kernel(ids_ref, h0_ref, slab_ref, out_ref):
    """Whole AttSimpleRNN ('rnn') forward for one sentence pair.

    ids_ref : (2S, 1) int32 token ids, rows interleaved A_t, B_t   (VMEM)
    h0_ref  : (1, H)  f32 initial hidden state                     (VMEM)
    slab_ref: (SLAB_ROWS, WIDTH) f32 packed weights                (VMEM)
    out_ref : (1, O)  f32 sigmoid output                           (VMEM)
    """
    S2 = ids_ref.shape[0]
    S = S2 // 2
    H = HID

    # ---- embedding gather + input projection as ONE one-hot matmul ---------
    # table rows already hold  emb[v] @ W_ih^T + b_ih + b_hh  (padded rows = 0,
    # so an out-of-vocab id degrades to zeros instead of reading stale VMEM).
    ids = ids_ref[...]                                              # (2S, 1)
    iota = jax.lax.broadcasted_iota(jnp.int32, (S2, V_PAD), 1)
    onehot = (ids == iota).astype(jnp.float32)                      # (2S, V_PAD)
    table = slab_ref[pl.ds(TABLE_OFF, V_PAD), :]                    # (V_PAD, H)
    pre = jnp.dot(onehot, table, preferred_element_type=jnp.float32)  # (2S, H)

    # ---- both recurrences batched as a (2,H) carry, fully unrolled ----------
    #   h_t = tanh(pre_t + h_{t-1} @ W_hh^T)
    # bf16 MXU inputs (single-pass matmul), f32 accumulation + f32 elementwise.
    w_hh = slab_ref[pl.ds(WHH_OFF, H), :].astype(jnp.bfloat16)      # RHS, cast once
    h = jnp.broadcast_to(h0_ref[...], (2, H))                       # rows [hA, hB]
    for t in range(S):
        pre_t = pre[2 * t:2 * t + 2, :]                             # (2, H) static slice
        h = jnp.tanh(
            pre_t + jnp.dot(h.astype(jnp.bfloat16), w_hh,
                            preferred_element_type=jnp.float32))

    hidA = h[0:1, :]                                                # (1, H)
    hidB = h[1:2, :]                                                # (1, H)
    ht = hidA * hidB                                                # (1, H)
    hv = jnp.abs(hidA - hidB)                                       # (1, H)

    # ---- Double_Linear: two dots + add (no in-kernel concats) ---------------
    wA = slab_ref[pl.ds(WA_OFF, H), :]                              # (H, T)
    wB = slab_ref[pl.ds(WB_OFF, H), :]                              # (H, T)
    b_bi = slab_ref[pl.ds(BBI_OFF, 1), :]                           # (1, T)
    z = (jnp.dot(ht, wA, preferred_element_type=jnp.float32)
         + jnp.dot(hv, wB, preferred_element_type=jnp.float32)
         + b_bi)
    hv2 = jnp.tanh(z)                                               # (1, T)

    # ---- final Linear + sigmoid ---------------------------------------------
    w_lin = slab_ref[pl.ds(WLIN_OFF, TMP), :]                       # (T, WIDTH)
    b_lin = slab_ref[pl.ds(BLIN_OFF, 1), :]                         # (1, WIDTH)
    y = jnp.dot(hv2, w_lin, preferred_element_type=jnp.float32) + b_lin
    out_ref[...] = jax.nn.sigmoid(y[:, 0:OUT])                      # (1, O)


def pack_params(p):
    """Build the single (SLAB_ROWS, WIDTH) f32 weight slab consumed by the kernel.

    Done once at init time (not per call): includes the pre-projected token
    table  emb @ W_ih^T + b_ih + b_hh  (feedback item #2) and every small
    weight/bias padded to 8-sublane-aligned rows (feedback item #3).
    """
    table = p["embedding"] @ p["w_ih_t"] + p["b_rnn"]               # (V, H)

    def pad(x, rows, cols=WIDTH):
        out = jnp.zeros((rows, cols), jnp.float32)
        return out.at[: x.shape[0], : x.shape[1]].set(x.astype(jnp.float32))

    slab = jnp.concatenate(
        [
            pad(table, V_PAD),          # TABLE_OFF
            pad(p["w_hh_t"], HID),      # WHH_OFF
            pad(p["wA"], HID),          # WA_OFF
            pad(p["wB"], HID),          # WB_OFF
            pad(p["w_lin_t"], TMP),     # WLIN_OFF
            pad(p["b_bi"], 8),          # BBI_OFF
            pad(p["b_lin"], 8),         # BLIN_OFF
        ],
        axis=0,
    )
    assert slab.shape == (SLAB_ROWS, WIDTH)
    return slab


def att_simple_rnn_forward(sentA, sentB, hidden, slab):
    """One pallas_call: one-hot gather/projection + RNN recurrences + MLP head."""
    S = sentA.shape[0]
    # Interleave rows A_0, B_0, A_1, B_1, ... so pre[2t:2t+2] is step t's (2,H).
    ids = jnp.stack([sentA.astype(jnp.int32), sentB.astype(jnp.int32)], axis=1)
    ids = ids.reshape(2 * S, 1)
    h0 = hidden.reshape(1, HID).astype(jnp.float32)

    vmem = pl.BlockSpec(memory_space=pltpu.MemorySpace.VMEM)
    return pl.pallas_call(
        att_simple_rnn_kernel,
        out_shape=jax.ShapeDtypeStruct((1, OUT), jnp.float32),
        in_specs=[vmem, vmem, vmem],
        out_specs=vmem,
        # No grid: all operands (< 30 KiB) are single full-array VMEM blocks.
    )(ids, h0, slab)


def init_params(key, vocab_size, embedding_dim, hidden_dim, temp_dim, out_dim):
    ks = jax.random.split(key, 10)
    stdv_rnn = 1.0 / math.sqrt(hidden_dim)
    stdv_bi = 1.0 / math.sqrt(temp_dim)
    initrange = 0.1

    def uni(k, shape, a):
        return jax.random.uniform(k, shape, jnp.float32, minval=-a, maxval=a)

    # nn.RNN weights are (H, E) / (H, H) in torch; store transposed for x @ W.
    w_ih = uni(ks[0], (hidden_dim, embedding_dim), stdv_rnn)
    w_hh = uni(ks[1], (hidden_dim, hidden_dim), stdv_rnn)
    b_ih = uni(ks[2], (hidden_dim,), stdv_rnn)
    b_hh = uni(ks[3], (hidden_dim,), stdv_rnn)

    # final nn.Linear weight is (O, T) in torch; store transposed.
    w_lin = uni(ks[7], (out_dim, temp_dim), initrange)
    b_lin = uni(ks[8], (out_dim,), 1.0 / math.sqrt(temp_dim))

    return {
        "embedding": jax.random.normal(ks[9], (vocab_size, embedding_dim), jnp.float32),
        "w_ih_t": w_ih.T,                                   # (E, H)
        "w_hh_t": w_hh.T,                                   # (H, H)
        "b_rnn": (b_ih + b_hh).reshape(1, hidden_dim),      # (1, H)
        "wA": uni(ks[4], (hidden_dim, temp_dim), initrange),
        "wB": uni(ks[5], (hidden_dim, temp_dim), initrange),
        "b_bi": uni(ks[6], (temp_dim,), stdv_bi).reshape(1, temp_dim),
        "w_lin_t": w_lin.T,                                 # (T, O)
        "b_lin": b_lin.reshape(1, out_dim),                 # (1, O)
    }


def reference_forward(sentA, sentB, hidden, p):
    """Pure-JAX f32 reference of the torch module (for tolerance check)."""
    def run(emb):
        h = hidden.reshape(1, HID).astype(jnp.float32)
        for t in range(emb.shape[0]):
            h = jnp.tanh(emb[t:t + 1] @ p["w_ih_t"] + p["b_rnn"] + h @ p["w_hh_t"])
        return h

    hidA = run(p["embedding"][sentA])
    hidB = run(p["embedding"][sentB])
    ht = hidA * hidB
    hv = jnp.abs(hidA - hidB)
    z = jnp.tanh(ht @ p["wA"] + hv @ p["wB"] + p["b_bi"])
    y = z @ p["w_lin_t"] + p["b_lin"]
    return jax.nn.sigmoid(y)


if __name__ == "__main__":
    key = jax.random.PRNGKey(0)
    k_par, k_a, k_b = jax.random.split(key, 3)

    params = init_params(k_par, VOCAB, EMB, HID, TMP, OUT)
    slab = jax.block_until_ready(pack_params(params))       # built once at init

    sentA = jax.random.randint(k_a, (SEQ,), 0, VOCAB, dtype=jnp.int32)
    sentB = jax.random.randint(k_b, (SEQ,), 0, VOCAB, dtype=jnp.int32)
    hidden = jnp.zeros((1, 1, HID), jnp.float32)             # initial_hidden() for 'rnn'

    out = att_simple_rnn_forward(sentA, sentB, hidden, slab)
    out = jax.block_until_ready(out)

    assert out.shape == (1, OUT)
    assert bool(jnp.all(jnp.isfinite(out)))

    ref = reference_forward(sentA, sentB, hidden, params)
    # bf16 MXU inputs in the recurrence dot → small numeric deviation allowed.
    assert bool(jnp.allclose(out, ref, atol=5e-2)), (out, ref)

    print("KERNEL_OK")
</pallas_src>

<mosaic_0001>
module attributes {stable_mosaic.version = 11 : i64} {
  func.func @att_simple_rnn_kernel(%arg0: memref<16x1xi32, #tpu.memory_space<vmem>>, %arg1: memref<1x32xf32, #tpu.memory_space<vmem>>, %arg2: memref<200x32xf32, #tpu.memory_space<vmem>>, %arg3: memref<1x4xf32, #tpu.memory_space<vmem>>) attributes {dimension_semantics = [], scalar_prefetch = 0 : i64, scratch_operands = 0 : i64, tpu.core_type = #tpu.core_type<tc>} {
    %c0 = arith.constant 0 : index
    %c0_0 = arith.constant 0 : index
    %0 = vector.load %arg0[%c0, %c0_0] : memref<16x1xi32, #tpu.memory_space<vmem>>, vector<16x1xi32>
    %1 = tpu.iota {dimensions = array<i32: 1>} : vector<16x56xi32>
    %2 = vector.broadcast %0 : vector<16x1xi32> to vector<16x56xi32>
    %3 = arith.cmpi eq, %2, %1 : vector<16x56xi32>
    %4 = arith.extui %3 : vector<16x56xi1> to vector<16x56xi32>
    %5 = arith.sitofp %4 : vector<16x56xi32> to vector<16x56xf32>
    %c0_1 = arith.constant 0 : index
    %c0_2 = arith.constant 0 : index
    %6 = vector.load %arg2[%c0_1, %c0_2] : memref<200x32xf32, #tpu.memory_space<vmem>>, vector<56x32xf32>
    %cst = arith.constant dense<0.000000e+00> : vector<16x32xf32>
    %7 = tpu.matmul %5, %6, %cst {dimension_numbers = #tpu.dot_dimension_numbers<[1], [0], [0], [1], [0, 0, 1, 1], [], []>} : vector<16x56xf32>, vector<56x32xf32>, vector<16x32xf32> -> vector<16x32xf32>
    %c56 = arith.constant 56 : index
    %c0_3 = arith.constant 0 : index
    %8 = vector.load %arg2[%c56, %c0_3] : memref<200x32xf32, #tpu.memory_space<vmem>>, vector<32x32xf32>
    %9 = arith.truncf %8 : vector<32x32xf32> to vector<32x32xbf16>
    %c0_4 = arith.constant 0 : index
    %c0_5 = arith.constant 0 : index
    %10 = vector.load %arg1[%c0_4, %c0_5] : memref<1x32xf32, #tpu.memory_space<vmem>>, vector<1x32xf32>
    %11 = vector.shape_cast %10 : vector<1x32xf32> to vector<1x32xf32>
    %12 = vector.broadcast %11 : vector<1x32xf32> to vector<2x32xf32>
    %13 = vector.extract_strided_slice %7 {offsets = [0, 0], sizes = [2, 32], strides = [1, 1]} : vector<16x32xf32> to vector<2x32xf32>
    %14 = arith.truncf %12 : vector<2x32xf32> to vector<2x32xbf16>
    %cst_6 = arith.constant dense<0.000000e+00> : vector<2x32xf32>
    %15 = tpu.matmul %14, %9, %cst_6 {dimension_numbers = #tpu.dot_dimension_numbers<[1], [0], [0], [1], [0, 0, 1, 1], [], []>} : vector<2x32xbf16>, vector<32x32xbf16>, vector<2x32xf32> -> vector<2x32xf32>
    %16 = arith.addf %13, %15 : vector<2x32xf32>
    %17 = math.tanh %16 : vector<2x32xf32>
    %18 = vector.extract_strided_slice %7 {offsets = [2, 0], sizes = [2, 32], strides = [1, 1]} : vector<16x32xf32> to vector<2x32xf32>
    %19 = arith.truncf %17 : vector<2x32xf32> to vector<2x32xbf16>
    %cst_7 = arith.constant dense<0.000000e+00> : vector<2x32xf32>
    %20 = tpu.matmul %19, %9, %cst_7 {dimension_numbers = #tpu.dot_dimension_numbers<[1], [0], [0], [1], [0, 0, 1, 1], [], []>} : vector<2x32xbf16>, vector<32x32xbf16>, vector<2x32xf32> -> vector<2x32xf32>
    %21 = arith.addf %18, %20 : vector<2x32xf32>
    %22 = math.tanh %21 : vector<2x32xf32>
    %23 = vector.extract_strided_slice %7 {offsets = [4, 0], sizes = [2, 32], strides = [1, 1]} : vector<16x32xf32> to vector<2x32xf32>
    %24 = arith.truncf %22 : vector<2x32xf32> to vector<2x32xbf16>
    %cst_8 = arith.constant dense<0.000000e+00> : vector<2x32xf32>
    %25 = tpu.matmul %24, %9, %cst_8 {dimension_numbers = #tpu.dot_dimension_numbers<[1], [0], [0], [1], [0, 0, 1, 1], [], []>} : vector<2x32xbf16>, vector<32x32xbf16>, vector<2x32xf32> -> vector<2x32xf32>
    %26 = arith.addf %23, %25 : vector<2x32xf32>
    %27 = math.tanh %26 : vector<2x32xf32>
    %28 = vector.extract_strided_slice %7 {offsets = [6, 0], sizes = [2, 32], strides = [1, 1]} : vector<16x32xf32> to vector<2x32xf32>
    %29 = arith.truncf %27 : vector<2x32xf32> to vector<2x32xbf16>
    %cst_9 = arith.constant dense<0.000000e+00> : vector<2x32xf32>
    %30 = tpu.matmul %29, %9, %cst_9 {dimension_numbers = #tpu.dot_dimension_numbers<[1], [0], [0], [1], [0, 0, 1, 1], [], []>} : vector<2x32xbf16>, vector<32x32xbf16>, vector<2x32xf32> -> vector<2x32xf32>
    %31 = arith.addf %28, %30 : vector<2x32xf32>
    %32 = math.tanh %31 : vector<2x32xf32>
    %33 = vector.extract_strided_slice %7 {offsets = [8, 0], sizes = [2, 32], strides = [1, 1]} : vector<16x32xf32> to vector<2x32xf32>
    %34 = arith.truncf %32 : vector<2x32xf32> to vector<2x32xbf16>
    %cst_10 = arith.constant dense<0.000000e+00> : vector<2x32xf32>
    %35 = tpu.matmul %34, %9, %cst_10 {dimension_numbers = #tpu.dot_dimension_numbers<[1], [0], [0], [1], [0, 0, 1, 1], [], []>} : vector<2x32xbf16>, vector<32x32xbf16>, vector<2x32xf32> -> vector<2x32xf32>
    %36 = arith.addf %33, %35 : vector<2x32xf32>
    %37 = math.tanh %36 : vector<2x32xf32>
    %38 = vector.extract_strided_slice %7 {offsets = [10, 0], sizes = [2, 32], strides = [1, 1]} : vector<16x32xf32> to vector<2x32xf32>
    %39 = arith.truncf %37 : vector<2x32xf32> to vector<2x32xbf16>
    %cst_11 = arith.constant dense<0.000000e+00> : vector<2x32xf32>
    %40 = tpu.matmul %39, %9, %cst_11 {dimension_numbers = #tpu.dot_dimension_numbers<[1], [0], [0], [1], [0, 0, 1, 1], [], []>} : vector<2x32xbf16>, vector<32x32xbf16>, vector<2x32xf32> -> vector<2x32xf32>
    %41 = arith.addf %38, %40 : vector<2x32xf32>
    %42 = math.tanh %41 : vector<2x32xf32>
    %43 = vector.extract_strided_slice %7 {offsets = [12, 0], sizes = [2, 32], strides = [1, 1]} : vector<16x32xf32> to vector<2x32xf32>
    %44 = arith.truncf %42 : vector<2x32xf32> to vector<2x32xbf16>
    %cst_12 = arith.constant dense<0.000000e+00> : vector<2x32xf32>
    %45 = tpu.matmul %44, %9, %cst_12 {dimension_numbers = #tpu.dot_dimension_numbers<[1], [0], [0], [1], [0, 0, 1, 1], [], []>} : vector<2x32xbf16>, vector<32x32xbf16>, vector<2x32xf32> -> vector<2x32xf32>
    %46 = arith.addf %43, %45 : vector<2x32xf32>
    %47 = math.tanh %46 : vector<2x32xf32>
    %48 = vector.extract_strided_slice %7 {offsets = [14, 0], sizes = [2, 32], strides = [1, 1]} : vector<16x32xf32> to vector<2x32xf32>
    %49 = arith.truncf %47 : vector<2x32xf32> to vector<2x32xbf16>
    %cst_13 = arith.constant dense<0.000000e+00> : vector<2x32xf32>
    %50 = tpu.matmul %49, %9, %cst_13 {dimension_numbers = #tpu.dot_dimension_numbers<[1], [0], [0], [1], [0, 0, 1, 1], [], []>} : vector<2x32xbf16>, vector<32x32xbf16>, vector<2x32xf32> -> vector<2x32xf32>
    %51 = arith.addf %48, %50 : vector<2x32xf32>
    %52 = math.tanh %51 : vector<2x32xf32>
    %53 = vector.extract_strided_slice %52 {offsets = [0, 0], sizes = [1, 32], strides = [1, 1]} : vector<2x32xf32> to vector<1x32xf32>
    %54 = vector.extract_strided_slice %52 {offsets = [1, 0], sizes = [1, 32], strides = [1, 1]} : vector<2x32xf32> to vector<1x32xf32>
    %55 = arith.mulf %53, %54 : vector<1x32xf32>
    %56 = arith.subf %53, %54 : vector<1x32xf32>
    %57 = math.absf %56 : vector<1x32xf32>
    %c88 = arith.constant 88 : index
    %c0_14 = arith.constant 0 : index
    %58 = vector.load %arg2[%c88, %c0_14] : memref<200x32xf32, #tpu.memory_space<vmem>>, vector<32x32xf32>
    %c120 = arith.constant 120 : index
    %c0_15 = arith.constant 0 : index
    %59 = vector.load %arg2[%c120, %c0_15] : memref<200x32xf32, #tpu.memory_space<vmem>>, vector<32x32xf32>
    %c184 = arith.constant 184 : index
    %c0_16 = arith.constant 0 : index
    %60 = vector.load %arg2[%c184, %c0_16] : memref<200x32xf32, #tpu.memory_space<vmem>>, vector<1x32xf32>
    %cst_17 = arith.constant dense<0.000000e+00> : vector<1x32xf32>
    %61 = tpu.matmul %55, %58, %cst_17 {dimension_numbers = #tpu.dot_dimension_numbers<[1], [0], [0], [1], [0, 0, 1, 1], [], []>} : vector<1x32xf32>, vector<32x32xf32>, vector<1x32xf32> -> vector<1x32xf32>
    %cst_18 = arith.constant dense<0.000000e+00> : vector<1x32xf32>
    %62 = tpu.matmul %57, %59, %cst_18 {dimension_numbers = #tpu.dot_dimension_numbers<[1], [0], [0], [1], [0, 0, 1, 1], [], []>} : vector<1x32xf32>, vector<32x32xf32>, vector<1x32xf32> -> vector<1x32xf32>
    %63 = arith.addf %61, %62 : vector<1x32xf32>
    %64 = arith.addf %63, %60 : vector<1x32xf32>
    %65 = math.tanh %64 : vector<1x32xf32>
    %c152 = arith.constant 152 : index
    %c0_19 = arith.constant 0 : index
    %66 = vector.load %arg2[%c152, %c0_19] : memref<200x32xf32, #tpu.memory_space<vmem>>, vector<32x32xf32>
    %c192 = arith.constant 192 : index
    %c0_20 = arith.constant 0 : index
    %67 = vector.load %arg2[%c192, %c0_20] : memref<200x32xf32, #tpu.memory_space<vmem>>, vector<1x32xf32>
    %cst_21 = arith.constant dense<0.000000e+00> : vector<1x32xf32>
    %68 = tpu.matmul %65, %66, %cst_21 {dimension_numbers = #tpu.dot_dimension_numbers<[1], [0], [0], [1], [0, 0, 1, 1], [], []>} : vector<1x32xf32>, vector<32x32xf32>, vector<1x32xf32> -> vector<1x32xf32>
    %69 = arith.addf %68, %67 : vector<1x32xf32>
    %70 = vector.extract_strided_slice %69 {offsets = [0, 0], sizes = [1, 4], strides = [1, 1]} : vector<1x32xf32> to vector<1x4xf32>
    %71 = arith.negf %70 : vector<1x4xf32>
    %72 = math.exp %71 : vector<1x4xf32>
    %cst_22 = arith.constant 1.000000e+00 : f32
    %73 = vector.broadcast %cst_22 : f32 to vector<1x4xf32>
    %74 = arith.addf %73, %72 : vector<1x4xf32>
    %75 = arith.divf %73, %74 : vector<1x4xf32>
    %c0_23 = arith.constant 0 : index
    %c0_24 = arith.constant 0 : index
    %76 = vector.load %arg3[%c0_23, %c0_24] : memref<1x4xf32, #tpu.memory_space<vmem>>, vector<1x4xf32>
    tpu.vector_store %arg3[%c0_23, %c0_24], %75 {strides = array<i32>} : memref<1x4xf32, #tpu.memory_space<vmem>>, vector<1x4xf32>,
    return
  }
}

</mosaic_0001>

<bundles_post_ra>
// kernel: tpu_custom_call.1
= control target key start
LH: loop header
LB: loop body
LE: loop exit
PB: predicated region body
PF: predicated region fallthrough
CT: control target
= control target key end

     0   :  { %v1057_v2 = vmov 0   ;;  %v1058_v7 = vmov 0.0   ;;  %s1255_s0 = inlined_call_operand.vmem [shape: s32[16,1], index: 0, kind: input, shape index: {}]   ;;  %s1256_s1 = inlined_call_operand.vmem [shape: f32[1,32], index: 1, kind: input, shape index: {}]   ;;  %s1257_s2 = inlined_call_operand.vmem [shape: f32[200,32], index: 2, kind: input, shape index: {}]   ;;  %s1258_s3 = inlined_call_operand.hbm [shape: f32[1,4], index: 3, kind: output, shape index: {}]  }
   0x1   :  { %v16_v0 = vld [vmem:[%s1255_s0] sm:$0xff]  ;;  %1010 = vset.pattern.permute.xlu0 %v1057_v2  ;;  %v17_v3 = vld [vmem:[%s1255_s0 + $0x8] sm:$0xff]  ;;  %v34_v5 = vld [vmem:[%s1257_s2 + $0x10] sm:$0xff]  ;;  %878 = vmatprep.subr.bf16.mxu1 %v1058_v7 }
   0x2   :  { %v32_v1 = vld [vmem:[%s1257_s2] sm:$0xff]  ;;  %v33_v4 = vld [vmem:[%s1257_s2 + $0x8] sm:$0xff]  ;;  %v35_v6 = vld [vmem:[%s1257_s2 + $0x18] sm:$0xff]  ;;  %21 = vperm.xlu0 %1010, %v16_v0  }
   0x3   :  { %v975_v8 = vpack.c.bf16 %v33_v4, %v32_v1  ;;  %v979_v9 = vpack.c.bf16 %v35_v6, %v34_v5  ;;  %v121_v10 = vld [vmem:[%s1257_s2 + $0x38] sm:$0xff]  ;;  %v122_v11 = vld [vmem:[%s1257_s2 + $0x40] sm:$0xff]  ;;  %v37_v14 = vld [vmem:[%s1257_s2 + $0x28] sm:$0xff] }
   0x4   :  { %v36_v12 = vld [vmem:[%s1257_s2 + $0x20] sm:$0xff]  ;;  %v1110_v13 = vpack.c.bf16 %v122_v11, %v121_v10  ;;  %v123_v15 = vld [vmem:[%s1257_s2 + $0x48] sm:$0xff]  ;;  %v124_v16 = vld [vmem:[%s1257_s2 + $0x50] sm:$0xff] }
   0x5   :  { %976 = vmatprep.subr.bf16.mxu0 %v975_v8 }
   0x6   :  { %8 = vsyncpa [#allocation3], 0  ;;  %978 = vmatpush3.bf16.msra.mxu0 %v975_v8  ;;  %879 = vmatpush3.bf16.msra.mxu1 %v1110_v13  ;;  %v1122_v17 = vpack.c.bf16 %v124_v16, %v123_v15  ;;  %v800_v18 = vld [vmem:[%s1256_s1] ss:$0 sm:$0xff]  ;;  %v983_v19 = vpack.c.bf16 %v37_v14, %v36_v12  ;;  %vm1059_vm0 = vmmov 0   ;;  %vm135_vm1 = vcmask 261120  }
   0x7   :  { %24 = vperm.xlu0 %1010, %v17_v3   ;;  %980 = vmatprep.subr.bf16.mxu0 %v979_v9  ;;  %v134_v20 = vpack.c.bf16 %v800_v18, %v800_v18  ;;  %v38_v21 = vld [vmem:[%s1257_s2 + $0x30] sm:$0xff]  ;;  %v18_v22 = vlaneseq  ;;  %vm39_vm2 = vcmask 457728   ;;  %s1061_s11 = smov [#allocation2]   ;;  %vm780_vm5 = vcmask 24576  }
   0x8   :  { %880 = vmatprep.subr.bf16.mxu1 %v1058_v7  ;;  %882 = vmatprep.mubr.msk.bf16.mxu1 %vm1059_vm0, %v1058_v7  ;;  %s788_s1 = sshll.u32 %s1061_s11, 4  ;;  %s789_s1 = int_to_ptr.vmem [resolvable:$true] %s788_s1 }
   0x9   :  { %v19_v23 = vand.u32 127, %v18_v22  ;;  %s1033_s12 = scalar_lea.vmem %s789_s1, 16  ;;  %s1037_s13 = scalar_lea.vmem %s789_s1, 32 }
   0xa   :  { %982 = vmatpush3.bf16.msra.mxu0 %v979_v9  ;;  %881 = vmatpush3.bf16.msra.mxu1 %v1122_v17  ;;  %p1034_p0 = scmp.ne.s32.totalorder %s789_s1, %s1033_s12  ;;  %p1038_p1 = scmp.lt.s32.totalorder %s789_s1, %s789_s1 }
   0xb   :  { %984 = vmatprep.subr.bf16.mxu0 %v983_v19  ;;  %886 = vmatprep.subr.bf16.mxu1 %v1058_v7  ;;  %p1039_p2 = scmp.lt.s32.totalorder %s1037_s13, %s1033_s12 }
   0xd   :  { %883 = vmatmul.mubr.msk.bf16.vlgmr.msra.gmra.mrb[0].mxu1 %vm135_vm1, %v134_v20  ;;  %p1040_p3 = por %p1039_p2, %p1038_p1 }
   0xe   :  { %986 = vmatpush3.bf16.msra.mxu0 %v983_v19  ;;  %887 = vmatpush3.bf16.msra.mxu1 %v1110_v13 }
   0xf   :  { %873 = vmatprep.subr.mxu0 %v38_v21  ;;  %888 = vmatprep.subr.bf16.mxu1 %v1058_v7  ;;  %p1041_p4 = pnand %p1040_p3, %p1034_p0 }
  0x10   :  { %890 = vmatprep.mubr.msk.bf16.mxu1 %vm1059_vm0, %v1058_v7 }
  0x12   :  { %874 = vmatpush3.msra.mxu0 %v38_v21  ;;  %889 = vmatpush3.bf16.msra.mxu1 %v1122_v17 }
  0x13   :  { %894 = vmatprep.subr.bf16.mxu0 %v1058_v7  ;;  %902 = vmatprep.subr.bf16.mxu1 %v1058_v7 }
  0x81   :  { %v22_v24 = vpop.permute.xlu0 %21 }
  0x82   :  { %vm26_vm3 = vcmp.eq.s32.totalorder %v22_v24, %v19_v23 }
  0x83   :  { %v796_v25 = vsel %vm26_vm3, 1.0, %v1058_v7 }
  0x84   :  { %875 = vmatprep.mubr.msk.f32.mxu0 %vm39_vm2, %v796_v25 }
  0x86   :  { %v25_v26 = vpop.permute.xlu0 %24 }
  0x87   :  { %vm27_vm4 = vcmp.eq.s32.totalorder %v25_v26, %v19_v23  ;;  %v537_v26 = vld [vmem:[%s1257_s2 + $0x58] sm:$0xff] }
  0x88   :  { %v797_v27 = vsel %vm27_vm4, 1.0, %v1058_v7 }
  0x89   :  { %876 = vmatmul.mubr.msk.f32.vlgmr.msra.gmra.mrb[0].mxu0 %vm39_vm2, %v797_v27  ;;  %v538_v27 = vld [vmem:[%s1257_s2 + $0x60] sm:$0xff] }
  0x8a   :  { %895 = vmatpush3.bf16.msra.mxu0 %v1110_v13  ;;  %898 = vmatprep.mubr.msk.bf16.mxu0 %vm1059_vm0, %v1058_v7 }
  0x8b   :  { %896 = vmatprep.subr.bf16.mxu0 %v1058_v7 }
  0x8e   :  { %897 = vmatpush3.bf16.msra.mxu0 %v1122_v17 }
  0x8f   :  { %910 = vmatprep.subr.bf16.mxu0 %v1058_v7 }
  0xe0   :  { %v173_v28 = vpop.f32.mrb[0].mxu1 }
  0xe1   :  { %v884_v29 = vpop.f32.mrb[1].mxu1 }
  0xe2   :  { %v176_v30 = vpop.f32.mrb[2].mxu1  ;;  %v1060_v29 = vmov 0.0|0.0  }
  0xe3   :  { %v885_v31 = vpop.f32.mrb[3].mxu1  ;;  %v994_v30 = vpack.c.bf16 %v538_v27, %v537_v26 }
  0xe4   :  { %v542_v31 = vld [vmem:[%s1257_s2 + $0x80] sm:$0xff] }
 0x15c   :  { %v1151_v32 = vpop.f32.mrb[0].mxu0 }
 0x15d   :  { %v112_v33 = vpop.f32.mrb[1].mxu0 }
 0x15e   :  { %v179_v34 = vadd.f32 %v173_v28, %v112_v33  ;;  %v541_v28 = vld [vmem:[%s1257_s2 + $0x78] sm:$0xff] }
 0x160   :  { %1011 = vtanh.f32 %v179_v34  ;;  %v540_v34 = vld [vmem:[%s1257_s2 + $0x70] sm:$0xff] }
 0x16a   :  { %v1012_v35 = vpop.eup %1011 }
 0x16b   :  { %v181_v36 = vpack.c.bf16 %v1012_v35, %v1012_v35  ;;  %v988_v35 = vpack.c.bf16 %v542_v31, %v541_v28 }
 0x16d   :  { %891 = vmatmul.mubr.msk.bf16.vlgmr.msra.gmra.mrb[4].mxu1 %vm135_vm1, %v181_v36  ;;  %v543_v36 = vld [vmem:[%s1257_s2 + $0x88] sm:$0xff] }
 0x16e   :  { %903 = vmatpush3.bf16.msra.mxu1 %v1110_v13  ;;  %906 = vmatprep.mubr.msk.bf16.mxu1 %vm1059_vm0, %v1058_v7 }
 0x16f   :  { %904 = vmatprep.subr.bf16.mxu1 %v1058_v7 }
 0x172   :  { %905 = vmatpush3.bf16.msra.mxu1 %v1122_v17 }
 0x173   :  { %918 = vmatprep.subr.bf16.mxu1 %v1058_v7 }
 0x240   :  { %v219_v37 = vpop.f32.mrb[4].mxu1 }
 0x241   :  { %v226_v38 = vrot.slane %v219_v37, 6  ;;  %v892_v39 = vpop.f32.mrb[5].mxu1  ;;  %v544_v37 = vld [vmem:[%s1257_s2 + $0x90] sm:$0xff] }
 0x242   :  { %v222_v40 = vpop.f32.mrb[6].mxu1  ;;  %v991_v39 = vpack.c.bf16 %v544_v37, %v543_v36 }
 0x243   :  { %v228_v41 = vadd.f32 %v226_v38, %v112_v33  ;;  %v893_v42 = vpop.f32.mrb[7].mxu1 }
 0x245   :  { %1013 = vtanh.f32 %v228_v41 }
 0x24f   :  { %v1014_v43 = vpop.eup %1013 }
 0x250   :  { %v230_v44 = vpack.c.bf16 %v1014_v43, %v1014_v43 }
 0x252   :  { %v232_v45 = vrot.slane %v230_v44, 1 }
 0x254   :  { %899 = vmatmul.mubr.msk.bf16.vlgmr.msra.gmra.mrb[4].mxu0 %vm135_vm1, %v232_v45 }
 0x255   :  { %911 = vmatpush3.bf16.msra.mxu0 %v1110_v13  ;;  %914 = vmatprep.mubr.msk.bf16.mxu0 %vm1059_vm0, %v1058_v7 }
 0x256   :  { %912 = vmatprep.subr.bf16.mxu0 %v1058_v7 }
 0x259   :  { %913 = vmatpush3.bf16.msra.mxu0 %v1122_v17 }
 0x25a   :  { %926 = vmatprep.subr.bf16.mxu0 %v1058_v7 }
 0x327   :  { %v270_v46 = vpop.f32.mrb[4].mxu0 }
 0x328   :  { %v277_v47 = vrot.slane %v270_v46, 4  ;;  %v900_v48 = vpop.f32.mrb[5].mxu0 }
 0x329   :  { %v273_v49 = vpop.f32.mrb[6].mxu0 }
 0x32a   :  { %v279_v50 = vadd.f32 %v277_v47, %v112_v33  ;;  %v901_v51 = vpop.f32.mrb[7].mxu0 }
 0x32c   :  { %1015 = vtanh.f32 %v279_v50 }
 0x336   :  { %v1016_v52 = vpop.eup %1015 }
 0x337   :  { %v281_v53 = vpack.c.bf16 %v1016_v52, %v1016_v52 }
 0x339   :  { %v283_v54 = vrot.slane %v281_v53, 2  ;;  %v697_v53 = vld [vmem:[%s1257_s2 + $0xa0] sm:$0xff] }
 0x33b   :  { %907 = vmatmul.mubr.msk.bf16.vlgmr.msra.gmra.mrb[8].mxu1 %vm135_vm1, %v283_v54  ;;  %v698_v54 = vld [vmem:[%s1257_s2 + $0xa8] sm:$0xff] }
 0x33c   :  { %919 = vmatpush3.bf16.msra.mxu1 %v1110_v13  ;;  %922 = vmatprep.mubr.msk.bf16.mxu1 %vm1059_vm0, %v1058_v7 }
 0x33d   :  { %920 = vmatprep.subr.bf16.mxu1 %v1058_v7 }
 0x340   :  { %921 = vmatpush3.bf16.msra.mxu1 %v1122_v17 }
 0x341   :  { %934 = vmatprep.subr.bf16.mxu1 %v1058_v7 }
 0x40e   :  { %v321_v55 = vpop.f32.mrb[8].mxu1 }
 0x40f   :  { %v328_v56 = vrot.slane %v321_v55, 2  ;;  %v908_v57 = vpop.f32.mrb[9].mxu1 }
 0x410   :  { %v324_v58 = vpop.f32.mrb[10].mxu1 }
 0x411   :  { %v330_v59 = vadd.f32 %v328_v56, %v112_v33  ;;  %v909_v60 = vpop.f32.mrb[11].mxu1  ;;  %v539_v33 = vld [vmem:[%s1257_s2 + $0x68] sm:$0xff]  ;;  %v699_v56 = vld [vmem:[%s1257_s2 + $0xb0] sm:$0xff] }
 0x412   :  { %v997_v38 = vpack.c.bf16 %v540_v34, %v539_v33  ;;  %v1003_v57 = vpack.c.bf16 %v699_v56, %v698_v54 }
 0x413   :  { %1017 = vtanh.f32 %v330_v59  ;;  %v545_v59 = vld [vmem:[%s1257_s2 + $0xb8] sm:$0x1] }
 0x41d   :  { %v1018_v61 = vpop.eup %1017 }
 0x41e   :  { %v332_v62 = vpack.c.bf16 %v1018_v61, %v1018_v61 }
 0x420   :  { %v334_v63 = vrot.slane %v332_v62, 3 }
 0x422   :  { %915 = vmatmul.mubr.msk.bf16.vlgmr.msra.gmra.mrb[8].mxu0 %vm135_vm1, %v334_v63 }
 0x423   :  { %927 = vmatpush3.bf16.msra.mxu0 %v1110_v13  ;;  %930 = vmatprep.mubr.msk.bf16.mxu0 %vm1059_vm0, %v1058_v7 }
 0x424   :  { %928 = vmatprep.subr.bf16.mxu0 %v1058_v7 }
 0x427   :  { %929 = vmatpush3.bf16.msra.mxu0 %v1122_v17 }
 0x428   :  { %987 = vmatprep.subr.bf16.mxu0 %v1060_v29 }
 0x4f5   :  { %v372_v0 = vpop.f32.mrb[8].mxu0 }
 0x4f6   :  { %v378_v1 = vadd.f32 %v1151_v32, %v372_v0  ;;  %v916_v2 = vpop.f32.mrb[9].mxu0 }
 0x4f7   :  { %v375_v3 = vpop.f32.mrb[10].mxu0 }
 0x4f8   :  { %1019 = vtanh.f32 %v378_v1  ;;  %v917_v4 = vpop.f32.mrb[11].mxu0  ;;  %v700_v1 = vld [vmem:[%s1257_s2 + $0xc0] sm:$0x1] }
 0x502   :  { %v1020_v5 = vpop.eup %1019 }
 0x503   :  { %v380_v6 = vpack.c.bf16 %v1020_v5, %v1020_v5 }
 0x505   :  { %923 = vmatmul.mubr.msk.bf16.vlgmr.msra.gmra.mrb[12].mxu1 %vm135_vm1, %v380_v6 }
 0x506   :  { %935 = vmatpush3.bf16.msra.mxu1 %v1110_v13  ;;  %938 = vmatprep.mubr.msk.bf16.mxu1 %vm1059_vm0, %v1058_v7 }
 0x507   :  { %936 = vmatprep.subr.bf16.mxu1 %v1058_v7 }
 0x50a   :  { %937 = vmatpush3.bf16.msra.mxu1 %v1122_v17 }
 0x50b   :  { %993 = vmatprep.subr.bf16.mxu1 %v1060_v29 }
 0x5d8   :  { %v418_v8 = vpop.f32.mrb[12].mxu1 }
 0x5d9   :  { %v425_v9 = vrot.slane %v418_v8, 6  ;;  %v924_v10 = vpop.f32.mrb[13].mxu1 }
 0x5da   :  { %v421_v11 = vpop.f32.mrb[14].mxu1 }
 0x5db   :  { %v427_v12 = vadd.f32 %v1151_v32, %v425_v9  ;;  %v925_v14 = vpop.f32.mrb[15].mxu1 }
 0x5dd   :  { %1021 = vtanh.f32 %v427_v12 }
 0x5e7   :  { %v1022_v15 = vpop.eup %1021 }
 0x5e8   :  { %v429_v16 = vpack.c.bf16 %v1022_v15, %v1022_v15 }
 0x5ea   :  { %v431_v18 = vrot.slane %v429_v16, 1 }
 0x5ec   :  { %931 = vmatmul.mubr.msk.bf16.vlgmr.msra.gmra.mrb[12].mxu0 %vm135_vm1, %v431_v18 }
 0x5ed   :  { %950 = vmatprep.mubr.msk.f32.mxu0 %vm1059_vm0, %v1058_v7  ;;  %989 = vmatpush3.bf16.msra.mxu0 %v988_v35 }
 0x5ee   :  { %990 = vmatprep.subr.bf16.mxu0 %v1060_v29 }
 0x5f1   :  { %992 = vmatpush3.bf16.msra.mxu0 %v991_v39 }
 0x5f2   :  { %999 = vmatprep.subr.bf16.mxu0 %v1060_v29 }
 0x6bf   :  { %v469_v13 = vpop.f32.mrb[12].mxu0 }
 0x6c0   :  { %v476_v19 = vrot.slane %v469_v13, 4  ;;  %v932_v20 = vpop.f32.mrb[13].mxu0 }
 0x6c1   :  { %v472_v17 = vpop.f32.mrb[14].mxu0 }
 0x6c2   :  { %v478_v21 = vadd.f32 %v1151_v32, %v476_v19  ;;  %v933_v22 = vpop.f32.mrb[15].mxu0 }
 0x6c4   :  { %1023 = vtanh.f32 %v478_v21 }
 0x6ce   :  { %v1024_v23 = vpop.eup %1023 }
 0x6cf   :  { %v480_v24 = vpack.c.bf16 %v1024_v23, %v1024_v23 }
 0x6d1   :  { %v482_v25 = vrot.slane %v480_v24, 2 }
 0x6d3   :  { %939 = vmatmul.mubr.msk.bf16.vlgmr.msra.gmra.mrb[16].mxu1 %vm135_vm1, %v482_v25 }
 0x6d4   :  { %961 = vmatprep.mubr.msk.f32.mxu1 %vm1059_vm0, %v1058_v7  ;;  %995 = vmatpush3.bf16.msra.mxu1 %v994_v30 }
 0x6d5   :  { %996 = vmatprep.subr.bf16.mxu1 %v1060_v29 }
 0x6d8   :  { %998 = vmatpush3.bf16.msra.mxu1 %v997_v38 }
 0x7a6   :  { %v520_v40 = vpop.f32.mrb[16].mxu1 }
 0x7a7   :  { %v527_v41 = vrot.slane %v520_v40, 2  ;;  %v940_v42 = vpop.f32.mrb[17].mxu1 }
 0x7a8   :  { %v523_v43 = vpop.f32.mrb[18].mxu1 }
 0x7a9   :  { %v529_v44 = vadd.f32 %v1151_v32, %v527_v41  ;;  %v941_v45 = vpop.f32.mrb[19].mxu1  ;;  %v696_v32 = vld [vmem:[%s1257_s2 + $0x98] sm:$0xff] }
 0x7aa   :  { %v1000_v55 = vpack.c.bf16 %v697_v53, %v696_v32 }
 0x7ab   :  { %1025 = vtanh.f32 %v529_v44 }
 0x7b5   :  { %v1026_v46 = vpop.eup %1025 }
 0x7b6   :  { %v532_v47 = vrot.slane %v1026_v46, 1 }
 0x7b8   :  { %v534_v48 = vmul.f32 %v1026_v46, %v532_v47  ;;  %v535_v49 = vsub.f32 %v1026_v46, %v532_v47 }
 0x7ba   :  { %v621_v50 = vrot.slane %v534_v48, 6  ;;  %v536_v51 = vand.u32 2147483647, %v535_v49 }
 0x7bc   :  { %962 = vmatmul.mubr.msk.f32.vlgmr.msra.gmra.mrb[20].mxu1 %vm135_vm1, %v621_v50  ;;  %v547_v52 = vrot.slane %v536_v51, 6 }
 0x7be   :  { %951 = vmatmul.mubr.msk.f32.vlgmr.msra.gmra.mrb[2].mxu0 %vm135_vm1, %v547_v52 }
 0x7bf   :  { %972 = vmatprep.mubr.msk.f32.mxu0 %vm1059_vm0, %v1058_v7  ;;  %1001 = vmatpush3.bf16.msra.mxu0 %v1000_v55 }
 0x7c0   :  { %1002 = vmatprep.subr.bf16.mxu0 %v1060_v29 }
 0x7c3   :  { %1004 = vmatpush3.bf16.msra.mxu0 %v1003_v57 }
 0x88f   :  { %v690_v7 = vpop.f32.mrb[20].mxu1 }
 0x890   :  { %v963_v58 = vpop.f32.mrb[21].mxu1 }
 0x891   :  { %v616_v60 = vpop.f32.mrb[2].mxu0 }
 0x892   :  { %v691_v61 = vadd.f32 %v690_v7, %v616_v60  ;;  %v952_v62 = vpop.f32.mrb[3].mxu0 }
 0x894   :  { %v694_v63 = vadd.f32 %v691_v61, %v545_v59 }
 0x896   :  { %1027 = vtanh.f32 %v694_v63 }
 0x8a0   :  { %v1028_v0 = vpop.eup %1027 }
 0x8a1   :  { %973 = vmatmul.mubr.msk.f32.vlgmr.msra.gmra.mrb[16].mxu0 %vm135_vm1, %v1028_v0 }
 0x974   :  { %v770_v2 = vpop.f32.mrb[16].mxu0 }
 0x975   :  { %v771_v3 = vadd.f32 %v770_v2, %v700_v1  ;;  %v974_v4 = vpop.f32.mrb[17].mxu0 }
 0x977   :  { %v812_v5 = vmul.f32 -1.442695, %v771_v3 }
 0x979   :  { %1029 = vpow2.f32 %v812_v5 }
 0x983   :  { %v1030_v6 = vpop.eup %1029 }
 0x984   :  { %v777_v8 = vadd.f32 1.0, %v1030_v6 }
 0x986   :  { %1031 = vrcp.f32 %v777_v8 }
 0x990   :  { %v1032_v9 = vpop.eup %1031 }
 0x991   :  { %781 = vst.msk [vmem:[#allocation2] sm:$0x1] %vm780_vm5, %v1032_v9 }
 0x992   :  { %1044 = shalt.err (!%p1041_p4)
}
 0x993   :  { %s1045_s15 = scalar_lea.hbm %s1258_s3, 16 }
 0x994   :  { %p1046_p5 = scmp.ne.s32.totalorder %s1258_s3, %s1045_s15  ;;  %p1049_p6 = scmp.lt.u32.totalorder %s1045_s15, %s1258_s3 }
 0x996   :  { %p1051_p7 = pnand %p1049_p6, %p1046_p5 }
 0x998   :  { %1054 = shalt.err (!%p1051_p7)
}
 0x999   :  { %791 = dma.vmem_to_hbm [thread:$0]  %s789_s1, 16, %s1258_s3, [#allocation3]  }
 0x99a   :  { %1055 = dma.done.wait [#allocation3], 16  }
 0x99b   :  { %1056 = vsyncadd [#allocation3], 4294967280 }
 0x99c   :  { %795 = vsyncpa [#allocation3], 1 }

</bundles_post_ra>
